<compile_context>
chip_gen: v7x
topology: tpu7x:2x2x1
jax: 0.10.0
libtpu: 0.0.40
codegen_flags: <defaults>
</compile_context>

<pallas_src>
import functools

import jax
import jax.numpy as jnp
from jax.experimental import pallas as pl
from jax.experimental.pallas import tpu as pltpu


def _round_up(n, m):
    return ((n + m - 1) // m) * m


# ----------------------------------------------------------------------------
# Pallas kernels
# ----------------------------------------------------------------------------
def _linear_kernel(x_ref, w_ref, b_ref, o_ref):
    """One (block_m, K) x (K, N) tile:  o = x @ w + b  (bf16 in, f32 accumulate)."""
    y = jnp.dot(x_ref[...], w_ref[...], preferred_element_type=jnp.float32)
    o_ref[...] = y + b_ref[...]


def pallas_linear(x, w_kn, b_row, *, block_m=256):
    """x: (M, K); w_kn: (K, N) pre-transposed bf16; b_row: (1, N) f32 -> (M, N) f32.

    Tiled over M with a 1-D grid (double-buffered HBM<->VMEM pipelining,
    "parallel" so the rows can be split across TensorCores on v7x).
    """
    M, K = x.shape
    Kw, N = w_kn.shape
    assert Kw == K
    bm = min(block_m, _round_up(M, 8))
    Mp = _round_up(M, bm)
    if Mp != M:
        x = jnp.pad(x, ((0, Mp - M), (0, 0)))
    x = x.astype(jnp.bfloat16)

    out = pl.pallas_call(
        _linear_kernel,
        out_shape=jax.ShapeDtypeStruct((Mp, N), jnp.float32),
        grid_spec=pltpu.PrefetchScalarGridSpec(
            num_scalar_prefetch=0,
            grid=(Mp // bm,),
            in_specs=[
                pl.BlockSpec((bm, K), lambda i: (i, 0)),
                pl.BlockSpec((K, N), lambda i: (0, 0)),
                pl.BlockSpec((1, N), lambda i: (0, 0)),
            ],
            out_specs=pl.BlockSpec((bm, N), lambda i: (i, 0)),
        ),
        compiler_params=pltpu.CompilerParams(
            dimension_semantics=("parallel",),
            vmem_limit_bytes=32 * 1024 * 1024),
    )(x, w_kn, b_row)
    return out[:M] if Mp != M else out


def _conv5_kernel(x_ref, w_ref, o_ref, *, t_out):
    """Valid k=5 conv along time, channels-last, as 5 shifted matmuls.

    x_ref: (1, T, Cin) bf16; w_ref: (5, Cin, Cout) bf16; o_ref: (1, t_out, Cout) f32.
    """
    x = x_ref[0]                                            # (T, Cin)
    acc = jnp.dot(x[0:t_out, :], w_ref[0], preferred_element_type=jnp.float32)
    for k in range(1, 5):
        acc = acc + jnp.dot(x[k:k + t_out, :], w_ref[k],
                            preferred_element_type=jnp.float32)
    o_ref[0] = acc


def pallas_conv1d_k5(x_cl, w5):
    """x_cl: (B, T, Cin) f32; w5: (5, Cin, Cout_pad) bf16 -> (B, T-4, Cout_pad) f32."""
    B, T, Cin = x_cl.shape
    Cout = w5.shape[2]
    Tout = T - 4
    return pl.pallas_call(
        functools.partial(_conv5_kernel, t_out=Tout),
        out_shape=jax.ShapeDtypeStruct((B, Tout, Cout), jnp.float32),
        grid_spec=pltpu.PrefetchScalarGridSpec(
            num_scalar_prefetch=0,
            grid=(B,),
            in_specs=[
                pl.BlockSpec((1, T, Cin), lambda b: (b, 0, 0)),
                pl.BlockSpec((5, Cin, Cout), lambda b: (0, 0, 0)),
            ],
            out_specs=pl.BlockSpec((1, Tout, Cout), lambda b: (b, 0, 0)),
        ),
        compiler_params=pltpu.CompilerParams(
            dimension_semantics=("parallel",),
            vmem_limit_bytes=32 * 1024 * 1024),
    )(x_cl.astype(jnp.bfloat16), w5)


# ----------------------------------------------------------------------------
# Mem-bound glue ops (plain JAX / XLA)
# ----------------------------------------------------------------------------
def batchnorm_train_cl(x, eps=1e-5):
    """BatchNorm1d training forward (gamma=1, beta=0), channels-last (B, T, C)."""
    mean = jnp.mean(x, axis=(0, 1), keepdims=True)
    var = jnp.mean(jnp.square(x - mean), axis=(0, 1), keepdims=True)   # biased
    return (x - mean) / jnp.sqrt(var + eps)


def stretch_and_boxfilter_cl(m, scale):
    """Stretch2d(scale,1) + Conv2d(1,1,(1,2s+1),pad=(0,s)) with weight 1/(2s+1).

    m: (B, T, C) channels-last -> (B, T*scale, C). Filter acts along time only.
    """
    m = jnp.repeat(m, scale, axis=1)
    k = 2 * scale + 1
    T = m.shape[1]
    mp = jnp.pad(m, ((0, 0), (scale, scale), (0, 0)))
    acc = mp[:, 0:T, :]
    for j in range(1, k):
        acc = acc + mp[:, j:j + T, :]
    return acc / float(k)


# ----------------------------------------------------------------------------
# MelResNet + UpsampleNetwork forward (channels-last)
# ----------------------------------------------------------------------------
def mel_resnet_cl(p, mels_cl, res_out_dims):
    B, T, _ = mels_cl.shape
    Tout = T - 4
    M = B * Tout
    C_pad = p["conv_in_w5"].shape[2]
    R_pad = p["conv_out_w"].shape[1]

    x = pallas_conv1d_k5(mels_cl, p["conv_in_w5"])                 # (B, Tout, C_pad)
    x = jnp.maximum(batchnorm_train_cl(x), 0.0)
    for rb in p["res"]:
        residual = x
        h = pallas_linear(x.reshape(M, C_pad), rb["w1"], p["zero_b"])
        h = jnp.maximum(batchnorm_train_cl(h.reshape(B, Tout, C_pad)), 0.0)
        h = pallas_linear(h.reshape(M, C_pad), rb["w2"], p["zero_b"])
        h = batchnorm_train_cl(h.reshape(B, Tout, C_pad))
        x = h + residual
    y = pallas_linear(x.reshape(M, C_pad), p["conv_out_w"], p["conv_out_b"])
    return y.reshape(B, Tout, R_pad)[:, :, :res_out_dims]          # drop lane padding


def upsample_network_forward(p, mels, *, upsample_scales, pad, res_out_dims):
    """mels: (B, feat_dims, T_mel) — same NCL layout as the PyTorch module."""
    total_scale = 1
    for s in upsample_scales:
        total_scale *= s
    indent = pad * total_scale

    mels_cl = jnp.transpose(mels, (0, 2, 1))          # single layout change (B,T,F)

    aux = mel_resnet_cl(p, mels_cl, res_out_dims)     # (B, T_mel-4, res_out)
    aux = jnp.repeat(aux, total_scale, axis=1)        # resnet_stretch

    m = mels_cl
    for s in upsample_scales:
        m = stretch_and_boxfilter_cl(m, s)
    m = m[:, indent:-indent, :]

    # channels-last already == the .transpose(1, 2) in the PyTorch forward
    return m, aux


# ----------------------------------------------------------------------------
# Parameters: raw (PyTorch layout) and prepared (pre-transposed / padded / bf16)
# ----------------------------------------------------------------------------
def init_raw_params(key, *, feat_dims, compute_dims, res_blocks, res_out_dims):
    keys = iter(jax.random.split(key, 4 + 2 * res_blocks))

    def W(shape, scale=0.1):
        return jax.random.normal(next(keys), shape, jnp.float32) * scale

    raw = {
        "conv_in_w": W((compute_dims, feat_dims, 5)),           # no bias
        "res": [{"conv1_w": W((compute_dims, compute_dims, 1)),
                 "conv2_w": W((compute_dims, compute_dims, 1))}
                for _ in range(res_blocks)],
        "conv_out_w": W((res_out_dims, compute_dims, 1)),
        "conv_out_b": W((res_out_dims,)),
    }
    return raw


def prepare_params(raw, *, compute_dims, res_out_dims):
    """Pre-transpose to (K, N), zero-pad N to 128 lanes, cast to bf16 — once."""
    C_pad = _round_up(compute_dims, 128)
    R_pad = _round_up(res_out_dims, 128)

    w_in = jnp.transpose(raw["conv_in_w"], (2, 1, 0))           # (5, F, C)
    w_in = jnp.pad(w_in, ((0, 0), (0, 0), (0, C_pad - compute_dims)))

    def to_kn(w_oi1, k_pad, n_pad):
        kn = w_oi1[:, :, 0].T                                   # (K=in, N=out)
        kn = jnp.pad(kn, ((0, k_pad - kn.shape[0]), (0, n_pad - kn.shape[1])))
        return kn.astype(jnp.bfloat16)

    p = {
        "conv_in_w5": w_in.astype(jnp.bfloat16),
        "zero_b": jnp.zeros((1, C_pad), jnp.float32),
        "res": [{"w1": to_kn(rb["conv1_w"], C_pad, C_pad),
                 "w2": to_kn(rb["conv2_w"], C_pad, C_pad)} for rb in raw["res"]],
        "conv_out_w": to_kn(raw["conv_out_w"], C_pad, R_pad),
        "conv_out_b": jnp.pad(raw["conv_out_b"],
                              (0, R_pad - res_out_dims)).reshape(1, R_pad),
    }
    return p


# ----------------------------------------------------------------------------
# Pure-JAX reference (channels-first, mirrors the PyTorch forward; matmul
# operands cast to bf16 exactly like the kernels so the comparison is tight)
# ----------------------------------------------------------------------------
def _ref_mm(x2d, w_oi):
    return jnp.dot(x2d.astype(jnp.bfloat16), w_oi.astype(jnp.bfloat16).T,
                   preferred_element_type=jnp.float32)


def _ref_bn(x, eps=1e-5):                       # x: (B, C, T)
    mean = jnp.mean(x, axis=(0, 2), keepdims=True)
    var = jnp.mean(jnp.square(x - mean), axis=(0, 2), keepdims=True)
    return (x - mean) / jnp.sqrt(var + eps)


def _ref_conv1x1(x, w_oi, b=None):              # x: (B, C, T)
    B, C, T = x.shape
    y = _ref_mm(x.transpose(0, 2, 1).reshape(B * T, C), w_oi)
    if b is not None:
        y = y + b[None, :]
    return y.reshape(B, T, -1).transpose(0, 2, 1)


def reference_upsample(raw, mels, upsample_scales, pad):
    B, F, T = mels.shape
    Tout = T - 4
    w_in = raw["conv_in_w"]
    pat = jnp.stack([mels[:, :, k:k + Tout] for k in range(5)], axis=-1)
    pat = pat.transpose(0, 2, 1, 3).reshape(B * Tout, F * 5)
    x = _ref_mm(pat, w_in.reshape(w_in.shape[0], F * 5))
    x = x.reshape(B, Tout, -1).transpose(0, 2, 1)
    x = jnp.maximum(_ref_bn(x), 0.0)
    for rb in raw["res"]:
        residual = x
        h = _ref_conv1x1(x, rb["conv1_w"][:, :, 0])
        h = jnp.maximum(_ref_bn(h), 0.0)
        h = _ref_conv1x1(h, rb["conv2_w"][:, :, 0])
        h = _ref_bn(h)
        x = h + residual
    aux = _ref_conv1x1(x, raw["conv_out_w"][:, :, 0], raw["conv_out_b"])

    total_scale = 1
    for s in upsample_scales:
        total_scale *= s
    aux = jnp.repeat(aux, total_scale, axis=-1)

    m = mels
    for s in upsample_scales:
        m = jnp.repeat(m, s, axis=-1)
        k = 2 * s + 1
        Tm = m.shape[-1]
        mp = jnp.pad(m, ((0, 0), (0, 0), (s, s)))
        acc = mp[:, :, 0:Tm]
        for j in range(1, k):
            acc = acc + mp[:, :, j:j + Tm]
        m = acc / float(k)
    indent = pad * total_scale
    m = m[:, :, indent:-indent]
    return m.transpose(0, 2, 1), aux.transpose(0, 2, 1)


# ----------------------------------------------------------------------------
if __name__ == "__main__":
    # Small hyper-parameters consistent with the module.
    feat_dims, compute_dims, res_out_dims, res_blocks = 16, 32, 16, 2
    upsample_scales, pad = (2, 2), 2          # total_scale = 4
    B, T_mel = 2, 8
    total_scale = 4

    key = jax.random.PRNGKey(0)
    k_p, k_m = jax.random.split(key)
    raw = init_raw_params(k_p, feat_dims=feat_dims, compute_dims=compute_dims,
                          res_blocks=res_blocks, res_out_dims=res_out_dims)
    params = prepare_params(raw, compute_dims=compute_dims,
                            res_out_dims=res_out_dims)

    mels = jax.random.normal(k_m, (B, feat_dims, T_mel), jnp.float32)

    fwd = jax.jit(functools.partial(upsample_network_forward,
                                    upsample_scales=upsample_scales, pad=pad,
                                    res_out_dims=res_out_dims))
    m_up, aux = jax.block_until_ready(fwd(params, mels))

    T_out = (T_mel - 2 * pad) * total_scale   # 16
    T_aux = (T_mel - 4) * total_scale         # 16
    assert m_up.shape == (B, T_out, feat_dims), m_up.shape
    assert aux.shape == (B, T_aux, res_out_dims), aux.shape
    assert bool(jnp.all(jnp.isfinite(m_up)))
    assert bool(jnp.all(jnp.isfinite(aux)))

    # Correctness vs a pure-JAX mirror of the PyTorch forward.
    m_ref, aux_ref = reference_upsample(raw, mels, upsample_scales, pad)
    assert bool(jnp.allclose(m_up, m_ref, atol=1e-4, rtol=1e-4)), \
        float(jnp.max(jnp.abs(m_up - m_ref)))
    assert bool(jnp.allclose(aux, aux_ref, atol=2e-2, rtol=2e-2)), \
        float(jnp.max(jnp.abs(aux - aux_ref)))
    print("KERNEL_OK")
</pallas_src>

<mosaic_0001>
module attributes {stable_mosaic.version = 11 : i64} {
  func.func @_conv5_kernel(%arg0: i32, %arg1: memref<1x8x16xbf16, #tpu.memory_space<vmem>>, %arg2: memref<5x16x128xbf16, #tpu.memory_space<vmem>>, %arg3: memref<1x4x128xf32, #tpu.memory_space<vmem>>) attributes {dimension_semantics = [#tpu.dimension_semantics<parallel>], iteration_bounds = array<i64: 2>, scalar_prefetch = 0 : i64, scratch_operands = 0 : i64, tpu.core_type = #tpu.core_type<tc>, window_params = [{transform_indices = @transform_0, window_bounds = array<i64: 1, 8, 16>}, {pipeline_mode = #tpu.pipeline_mode<synchronous>, transform_indices = @transform_1, window_bounds = array<i64: 5, 16, 128>}, {transform_indices = @transform_2, window_bounds = array<i64: 1, 4, 128>}]} {
    %c0 = arith.constant 0 : index
    %c0_0 = arith.constant 0 : index
    %c0_1 = arith.constant 0 : index
    %0 = vector.load %arg1[%c0, %c0_0, %c0_1] : memref<1x8x16xbf16, #tpu.memory_space<vmem>>, vector<1x8x16xbf16>
    %1 = vector.shape_cast %0 : vector<1x8x16xbf16> to vector<8x16xbf16>
    %2 = vector.extract_strided_slice %1 {offsets = [0, 0], sizes = [4, 16], strides = [1, 1]} : vector<8x16xbf16> to vector<4x16xbf16>
    %c0_2 = arith.constant 0 : index
    %c0_3 = arith.constant 0 : index
    %c0_4 = arith.constant 0 : index
    %3 = vector.load %arg2[%c0_2, %c0_3, %c0_4] : memref<5x16x128xbf16, #tpu.memory_space<vmem>>, vector<1x16x128xbf16>
    %4 = vector.shape_cast %3 : vector<1x16x128xbf16> to vector<16x128xbf16>
    %cst = arith.constant dense<0.000000e+00> : vector<4x128xf32>
    %5 = tpu.matmul %2, %4, %cst {dimension_numbers = #tpu.dot_dimension_numbers<[1], [0], [0], [1], [0, 0, 1, 1], [], []>} : vector<4x16xbf16>, vector<16x128xbf16>, vector<4x128xf32> -> vector<4x128xf32>
    %6 = vector.extract_strided_slice %1 {offsets = [1, 0], sizes = [4, 16], strides = [1, 1]} : vector<8x16xbf16> to vector<4x16xbf16>
    %c1 = arith.constant 1 : index
    %c0_5 = arith.constant 0 : index
    %c0_6 = arith.constant 0 : index
    %7 = vector.load %arg2[%c1, %c0_5, %c0_6] : memref<5x16x128xbf16, #tpu.memory_space<vmem>>, vector<1x16x128xbf16>
    %8 = vector.shape_cast %7 : vector<1x16x128xbf16> to vector<16x128xbf16>
    %cst_7 = arith.constant dense<0.000000e+00> : vector<4x128xf32>
    %9 = tpu.matmul %6, %8, %cst_7 {dimension_numbers = #tpu.dot_dimension_numbers<[1], [0], [0], [1], [0, 0, 1, 1], [], []>} : vector<4x16xbf16>, vector<16x128xbf16>, vector<4x128xf32> -> vector<4x128xf32>
    %10 = arith.addf %5, %9 : vector<4x128xf32>
    %11 = vector.extract_strided_slice %1 {offsets = [2, 0], sizes = [4, 16], strides = [1, 1]} : vector<8x16xbf16> to vector<4x16xbf16>
    %c2 = arith.constant 2 : index
    %c0_8 = arith.constant 0 : index
    %c0_9 = arith.constant 0 : index
    %12 = vector.load %arg2[%c2, %c0_8, %c0_9] : memref<5x16x128xbf16, #tpu.memory_space<vmem>>, vector<1x16x128xbf16>
    %13 = vector.shape_cast %12 : vector<1x16x128xbf16> to vector<16x128xbf16>
    %cst_10 = arith.constant dense<0.000000e+00> : vector<4x128xf32>
    %14 = tpu.matmul %11, %13, %cst_10 {dimension_numbers = #tpu.dot_dimension_numbers<[1], [0], [0], [1], [0, 0, 1, 1], [], []>} : vector<4x16xbf16>, vector<16x128xbf16>, vector<4x128xf32> -> vector<4x128xf32>
    %15 = arith.addf %10, %14 : vector<4x128xf32>
    %16 = vector.extract_strided_slice %1 {offsets = [3, 0], sizes = [4, 16], strides = [1, 1]} : vector<8x16xbf16> to vector<4x16xbf16>
    %c3 = arith.constant 3 : index
    %c0_11 = arith.constant 0 : index
    %c0_12 = arith.constant 0 : index
    %17 = vector.load %arg2[%c3, %c0_11, %c0_12] : memref<5x16x128xbf16, #tpu.memory_space<vmem>>, vector<1x16x128xbf16>
    %18 = vector.shape_cast %17 : vector<1x16x128xbf16> to vector<16x128xbf16>
    %cst_13 = arith.constant dense<0.000000e+00> : vector<4x128xf32>
    %19 = tpu.matmul %16, %18, %cst_13 {dimension_numbers = #tpu.dot_dimension_numbers<[1], [0], [0], [1], [0, 0, 1, 1], [], []>} : vector<4x16xbf16>, vector<16x128xbf16>, vector<4x128xf32> -> vector<4x128xf32>
    %20 = arith.addf %15, %19 : vector<4x128xf32>
    %21 = vector.extract_strided_slice %1 {offsets = [4, 0], sizes = [4, 16], strides = [1, 1]} : vector<8x16xbf16> to vector<4x16xbf16>
    %c4 = arith.constant 4 : index
    %c0_14 = arith.constant 0 : index
    %c0_15 = arith.constant 0 : index
    %22 = vector.load %arg2[%c4, %c0_14, %c0_15] : memref<5x16x128xbf16, #tpu.memory_space<vmem>>, vector<1x16x128xbf16>
    %23 = vector.shape_cast %22 : vector<1x16x128xbf16> to vector<16x128xbf16>
    %cst_16 = arith.constant dense<0.000000e+00> : vector<4x128xf32>
    %24 = tpu.matmul %21, %23, %cst_16 {dimension_numbers = #tpu.dot_dimension_numbers<[1], [0], [0], [1], [0, 0, 1, 1], [], []>} : vector<4x16xbf16>, vector<16x128xbf16>, vector<4x128xf32> -> vector<4x128xf32>
    %25 = arith.addf %20, %24 : vector<4x128xf32>
    %c0_17 = arith.constant 0 : index
    %c0_18 = arith.constant 0 : index
    %c0_19 = arith.constant 0 : index
    %26 = vector.load %arg3[%c0_17, %c0_18, %c0_19] : memref<1x4x128xf32, #tpu.memory_space<vmem>>, vector<1x4x128xf32>
    %27 = vector.shape_cast %26 : vector<1x4x128xf32> to vector<4x128xf32>
    %28 = vector.shape_cast %25 : vector<4x128xf32> to vector<1x4x128xf32>
    tpu.vector_store %arg3[%c0_17, %c0_18, %c0_19], %28 {strides = array<i32>} : memref<1x4x128xf32, #tpu.memory_space<vmem>>, vector<1x4x128xf32>,
    return
  }
  func.func @transform_0(%arg0: i32) -> (i32, i32, i32) {
    %c0_i32 = arith.constant 0 : i32
    %c0_i32_0 = arith.constant 0 : i32
    %c0_i32_1 = arith.constant 0 : i32
    return %arg0, %c0_i32, %c0_i32_0 : i32, i32, i32
  }
  func.func @transform_1(%arg0: i32) -> (i32, i32, i32) {
    %c0_i32 = arith.constant 0 : i32
    %c0_i32_0 = arith.constant 0 : i32
    %c0_i32_1 = arith.constant 0 : i32
    %c0_i32_2 = arith.constant 0 : i32
    return %c0_i32, %c0_i32_0, %c0_i32_1 : i32, i32, i32
  }
  func.func @transform_2(%arg0: i32) -> (i32, i32, i32) {
    %c0_i32 = arith.constant 0 : i32
    %c0_i32_0 = arith.constant 0 : i32
    %c0_i32_1 = arith.constant 0 : i32
    return %arg0, %c0_i32, %c0_i32_0 : i32, i32, i32
  }
}

module attributes {stable_mosaic.version = 11 : i64} {
  func.func @_linear_kernel(%arg0: i32, %arg1: memref<8x128xbf16, #tpu.memory_space<vmem>>, %arg2: memref<128x128xbf16, #tpu.memory_space<vmem>>, %arg3: memref<1x128xf32, #tpu.memory_space<vmem>>, %arg4: memref<8x128xf32, #tpu.memory_space<vmem>>) attributes {dimension_semantics = [#tpu.dimension_semantics<parallel>], iteration_bounds = array<i64: 1>, scalar_prefetch = 0 : i64, scratch_operands = 0 : i64, tpu.core_type = #tpu.core_type<tc>, window_params = [{transform_indices = @transform_0, window_bounds = array<i64: 8, 128>}, {pipeline_mode = #tpu.pipeline_mode<synchronous>, transform_indices = @transform_1, window_bounds = array<i64: 128, 128>}, {pipeline_mode = #tpu.pipeline_mode<synchronous>, transform_indices = @transform_2, window_bounds = array<i64: 1, 128>}, {transform_indices = @transform_3, window_bounds = array<i64: 8, 128>}]} {
    %c0 = arith.constant 0 : index
    %c0_0 = arith.constant 0 : index
    %0 = vector.load %arg1[%c0, %c0_0] : memref<8x128xbf16, #tpu.memory_space<vmem>>, vector<8x128xbf16>
    %c0_1 = arith.constant 0 : index
    %c0_2 = arith.constant 0 : index
    %1 = vector.load %arg2[%c0_1, %c0_2] : memref<128x128xbf16, #tpu.memory_space<vmem>>, vector<128x128xbf16>
    %cst = arith.constant dense<0.000000e+00> : vector<8x128xf32>
    %2 = tpu.matmul %0, %1, %cst {dimension_numbers = #tpu.dot_dimension_numbers<[1], [0], [0], [1], [0, 0, 1, 1], [], []>} : vector<8x128xbf16>, vector<128x128xbf16>, vector<8x128xf32> -> vector<8x128xf32>
    %c0_3 = arith.constant 0 : index
    %c0_4 = arith.constant 0 : index
    %3 = vector.load %arg3[%c0_3, %c0_4] : memref<1x128xf32, #tpu.memory_space<vmem>>, vector<1x128xf32>
    %4 = vector.broadcast %3 : vector<1x128xf32> to vector<8x128xf32>
    %5 = arith.addf %2, %4 : vector<8x128xf32>
    %c0_5 = arith.constant 0 : index
    %c0_6 = arith.constant 0 : index
    %6 = vector.load %arg4[%c0_5, %c0_6] : memref<8x128xf32, #tpu.memory_space<vmem>>, vector<8x128xf32>
    tpu.vector_store %arg4[%c0_5, %c0_6], %5 {strides = array<i32>} : memref<8x128xf32, #tpu.memory_space<vmem>>, vector<8x128xf32>,
    return
  }
  func.func @transform_0(%arg0: i32) -> (i32, i32) {
    %c0_i32 = arith.constant 0 : i32
    %c0_i32_0 = arith.constant 0 : i32
    return %arg0, %c0_i32 : i32, i32
  }
  func.func @transform_1(%arg0: i32) -> (i32, i32) {
    %c0_i32 = arith.constant 0 : i32
    %c0_i32_0 = arith.constant 0 : i32
    %c0_i32_1 = arith.constant 0 : i32
    return %c0_i32, %c0_i32_0 : i32, i32
  }
  func.func @transform_2(%arg0: i32) -> (i32, i32) {
    %c0_i32 = arith.constant 0 : i32
    %c0_i32_0 = arith.constant 0 : i32
    %c0_i32_1 = arith.constant 0 : i32
    return %c0_i32, %c0_i32_0 : i32, i32
  }
  func.func @transform_3(%arg0: i32) -> (i32, i32) {
    %c0_i32 = arith.constant 0 : i32
    %c0_i32_0 = arith.constant 0 : i32
    return %arg0, %c0_i32 : i32, i32
  }
}

</mosaic_0001>

<bundles_post_ra>
// kernel: upsample_network_forward.7
= control target key start
LH: loop header
LB: loop body
LE: loop exit
PB: predicated region body
PF: predicated region fallthrough
CT: control target
= control target key end

     0   :  { %v180_v0 = vmov 0.0   ;;  %vm181_vm0 = vmmov 0   ;;  %s235_s1 = inlined_call_operand.vmem [shape: bf16[128,128], index: 1, kind: input, shape index: {}]   ;;  %s236_s0 = inlined_call_operand.vmem [shape: bf16[8,128], index: 0, kind: input, shape index: {}]   ;;  %s237_s2 = inlined_call_operand.vmem [shape: f32[1,128], index: 2, kind: input, shape index: {}]   ;;  %s238_s3 = inlined_call_operand.vmem [shape: f32[8,128], index: 3, kind: output, shape index: {}]  }
   0x1   :  { %150 = vmatprep.subr.bf16.mxu0 %v180_v0  ;;  %v172_v1 = vld [vmem:[%s235_s1] sm:$0xff]   ;;  %166 = vmatprep.mubr.msk.bf16.mxu0 %vm181_vm0, %v180_v0  ;;  %v173_v2 = vld [vmem:[%s235_s1 + $0x8] sm:$0xff]   ;;  %v174_v3 = vld [vmem:[%s235_s1 + $0x10] sm:$0xff]  }
   0x2   :  { %151 = vmatpush3.bf16.msra.mxu0 %v172_v1  ;;  %v175_v4 = vld [vmem:[%s235_s1 + $0x18] sm:$0xff]   ;;  %v176_v5 = vld [vmem:[%s235_s1 + $0x20] sm:$0xff]   ;;  %v177_v6 = vld [vmem:[%s235_s1 + $0x28] sm:$0xff]  }
   0x3   :  { %152 = vmatprep.subr.bf16.mxu0 %v180_v0  ;;  %v178_v7 = vld [vmem:[%s235_s1 + $0x30] sm:$0xff]   ;;  %v179_v8 = vld [vmem:[%s235_s1 + $0x38] sm:$0xff]   ;;  %v15_v9 = vld [vmem:[%s236_s0] sm:$0xf] }
   0x4   :  { %v132_v10 = vld [vmem:[%s237_s2] ss:$0 sm:$0xff] }
   0x6   :  { %153 = vmatpush3.bf16.msra.mxu0 %v173_v2 }
   0x7   :  { %154 = vmatprep.subr.bf16.mxu0 %v180_v0 }
   0xa   :  { %155 = vmatpush3.bf16.msra.mxu0 %v174_v3 }
   0xb   :  { %156 = vmatprep.subr.bf16.mxu0 %v180_v0 }
   0xe   :  { %157 = vmatpush3.bf16.msra.mxu0 %v175_v4 }
   0xf   :  { %158 = vmatprep.subr.bf16.mxu0 %v180_v0 }
  0x12   :  { %159 = vmatpush3.bf16.msra.mxu0 %v176_v5 }
  0x13   :  { %160 = vmatprep.subr.bf16.mxu0 %v180_v0 }
  0x16   :  { %161 = vmatpush3.bf16.msra.mxu0 %v177_v6 }
  0x17   :  { %162 = vmatprep.subr.bf16.mxu0 %v180_v0 }
  0x1a   :  { %163 = vmatpush3.bf16.msra.mxu0 %v178_v7 }
  0x1b   :  { %164 = vmatprep.subr.bf16.mxu0 %v180_v0 }
  0x1e   :  { %165 = vmatpush3.bf16.msra.mxu0 %v179_v8 }
  0x21   :  { %167 = vmatmul.mubr.bf16.vlgmr.msra.gmra.mrb[0].mxu0 %v15_v9 }
  0xf4   :  { %v121_v11 = vpop.f32.mrb[0].mxu0 }
  0xf5   :  { %v122_v12 = vadd.f32 %v132_v10, %v121_v11  ;;  %v168_v13 = vpop.f32.mrb[1].mxu0 }
  0xf6   :  { %v124_v14 = vpop.f32.mrb[2].mxu0 }
  0xf7   :  { %127 = vst [vmem:[%s238_s3] sm:$0xff] %v122_v12  ;;  %v169_v15 = vpop.f32.mrb[3].mxu0 }

// kernel: upsample_network_forward.6
= control target key start
LH: loop header
LB: loop body
LE: loop exit
PB: predicated region body
PF: predicated region fallthrough
CT: control target
= control target key end

     0   :  { %s595_s9 = smov 0   ;;  %s644_s0 = inlined_call_operand.vmem [shape: bf16[2,8,16], index: 0, kind: input, shape index: {}]   ;;  %s645_s1 = inlined_call_operand.vmem [shape: bf16[5,16,128], index: 1, kind: input, shape index: {}]   ;;  %s646_s2 = inlined_call_operand.vmem [shape: f32[2,4,128], index: 2, kind: output, shape index: {}]  }
   0x1 LB: > { %s473_s10 = sadd.s32 4294967295, %s576_s9   ;;  %p477_p0 = scmp.ge.s32.totalorder %s576_s9, 1  ;;  %s576_s9 = sphi %s595_s9, %s12_s9  }
   0x2   : > { %p111_p1 = scmp.lt.s32.totalorder %s576_s9, 3 }
   0x4   : > { %p112_p2 = pnand %p477_p0, %p111_p1 }
   0x5   : > { %v564_v0 = vld [vmem:[%s645_s1 + $0x10] sm:$0xff] (!%p112_p2)   ;;  %v578_v1 = vmov (!%p112_p2), 0.0   ;;  %p131_p3 = scmp.lt.s32.totalorder (!%p112_p2), %s473_s10, 1  ;;  %vm579_vm0 = vmmov (!%p112_p2), 0   ;;  %v567_v2 = vld [vmem:[%s645_s1 + $0x8] sm:$0xff] (!%p112_p2)   ;;  %vm162_vm1 = vcmask (!%p112_p2), 130048  }
   0x6   : > { %115 = sbr.rel (%p112_p2) target bundleno = 260 (0x104), region = 28  ;;  %523 = vmatprep.subr.bf16.mxu0 (!%p112_p2), %v578_v1  ;;  %511 = vmatprep.subr.bf16.mxu1 (!%p112_p2), %v578_v1  ;;  %v566_v5 = vld [vmem:[%s645_s1 + $0x18] sm:$0xff] (!%p112_p2)   ;;  %v568_v10 = vld [vmem:[%s645_s1] sm:$0xff] (!%p112_p2)  }
   0x7   : > { %524 = vmatpush3.bf16.msra.mxu0 (!%p112_p2), %v564_v0  ;;  %525 = vmatprep.mubr.msk.bf16.mxu0 (!%p112_p2), %vm579_vm0, %v578_v1  ;;  %v569_v15 = vld [vmem:[%s645_s1 + $0x20] sm:$0xff] (!%p112_p2)  }
   0x8   : > { %529 = vmatprep.subr.bf16.mxu0 (!%p112_p2), %v578_v1  ;;  %513 = vmatprep.mubr.msk.bf16.mxu1 (!%p112_p2), %vm579_vm0, %v578_v1 }
   0x9   : > { %512 = vmatpush3.bf16.msra.mxu1 (!%p112_p2), %v567_v2 }
   0xa   : > { %517 = vmatprep.subr.bf16.mxu1 (!%p112_p2), %v578_v1 }
   0xd   : > { %s648_s10 = smov (!%p131_p3, %s473_s10), 1 }
   0xe   : > { %s478_s15 = sshll.u32 %s648_s10, 2 }
   0xf   : > { %s134_s18 = scalar_lea.vmem %s644_s0, %s478_s15  ;;  %s138_s27 = scalar_lea.vmem %s646_s2, %s478_s15 }
  0x10   : > { %v140_v3 = vld [vmem:[%s134_s18] sm:$0xf] }
  0x11   : > { %v482_v4 = vcombine.low %v140_v3, %v140_v3 }
  0x13   : > { %v258_v6 = vrot.slane %v482_v4, 1  ;;  %v150_v7 = vshrl.u32 %v482_v4, 16  ;;  %v152_v8 = vshll.u32 %v482_v4, 16  ;;  %v368_v16 = vrot.slane %v482_v4, 2 }
  0x15   : > { %526 = vmatmul.mubr.msk.bf16.vlgmr.msra.gmra.mrb[0].mxu0 %vm162_vm1, %v258_v6  ;;  %v154_v9 = vrot.slane %v152_v8, 1  ;;  %v312_v12 = vrot.slane %v150_v7, 1  ;;  %v313_v13 = vrot.slane %v152_v8, 2 }
  0x16   : > { %530 = vmatpush3.bf16.msra.mxu0 %v566_v5  ;;  %531 = vmatprep.mubr.msk.bf16.mxu0 %vm579_vm0, %v578_v1 }
  0x17   : > { %v155_v11 = vor.u32 %v154_v9, %v150_v7  ;;  %535 = vmatprep.subr.bf16.mxu0 %v578_v1  ;;  %v314_v14 = vor.u32 %v313_v13, %v312_v12 }
  0x19   : > { %514 = vmatmul.mubr.msk.bf16.vlgmr.msra.gmra.mrb[0].mxu1 %vm162_vm1, %v155_v11 }
  0x1a   : > { %518 = vmatpush3.bf16.msra.mxu1 %v568_v10  ;;  %519 = vmatprep.mubr.msk.bf16.mxu1 %vm579_vm0, %v578_v1 }
  0x21   : > { %532 = vmatmul.mubr.msk.bf16.vlgmr.msra.gmra.mrb[0].mxu0 %vm162_vm1, %v314_v14 }
  0x22   : > { %536 = vmatpush3.bf16.msra.mxu0 %v569_v15  ;;  %537 = vmatprep.mubr.msk.bf16.mxu0 %vm579_vm0, %v578_v1 }
  0x25   : > { %520 = vmatmul.mubr.msk.bf16.vlgmr.msra.gmra.mrb[0].mxu1 %vm162_vm1, %v140_v3 }
  0x2d   : > { %538 = vmatmul.mubr.msk.bf16.vlgmr.msra.gmra.mrb[0].mxu0 %vm162_vm1, %v368_v16 }
  0xf8   : > { %v249_v17 = vpop.f32.mrb[0].mxu1 }
  0xf9   : > { %v521_v18 = vpop.f32.mrb[1].mxu1 }
  0xfa   : > { %v252_v19 = vpop.f32.mrb[2].mxu1 }
  0xfb   : > { %v522_v20 = vpop.f32.mrb[3].mxu1 }
 0x100   : > { %v412_v21 = vpop.f32.mrb[0].mxu0 }
 0x101   : > { %v541_v22 = vadd.f32 %v412_v21, %v249_v17  ;;  %v539_v23 = vpop.f32.mrb[1].mxu0 }
 0x102   : > { %v415_v24 = vpop.f32.mrb[2].mxu0 }
 0x103   : > { %419 = vst [vmem:[%s138_s27] sm:$0xf] %v541_v22  ;;  %v540_v25 = vpop.f32.mrb[3].mxu0 }
 0x104 PF: > { %s12_s9 = sadd.s32 1, %s576_s9  }
 0x105   : > { %p9_p4 = scmp.ge.s32.totalorder %s12_s9, 4  }
 0x107   :  { %11 = sbr.rel (!%p9_p4) target bundleno = 1 (0x1), region = 62 }

</bundles_post_ra>
